<compile_context>
chip_gen: v7x
topology: tpu7x:2x2x1
jax: 0.10.0
libtpu: 0.0.40
codegen_flags: <defaults>
</compile_context>

<pallas_src>
import numpy as np
import jax
import jax.numpy as jnp
from jax.experimental import pallas as pl
from jax.experimental.pallas import tpu as pltpu


# ---------------------------------------------------------------------------
# Host-side weight construction (PyTorch align_corners=False bilinear)
# ---------------------------------------------------------------------------
def _bilinear_matrix_np(out_size: int, in_size: int, scale: float) -> np.ndarray:
    """1-D bilinear interpolation matrix matching PyTorch align_corners=False."""
    o = np.arange(out_size, dtype=np.float64)
    src = (o + 0.5) / scale - 0.5
    src = np.maximum(src, 0.0)                     # PyTorch clamps negatives to 0
    i0 = np.floor(src).astype(np.int64)
    frac = (src - i0).astype(np.float32)
    i1 = np.minimum(i0 + 1, in_size - 1)
    m = np.zeros((out_size, in_size), dtype=np.float32)
    rows = np.arange(out_size)
    np.add.at(m, (rows, i0), np.float32(1.0) - frac)
    np.add.at(m, (rows, i1), frac)
    return m


def _maybe_bf16(w_np: np.ndarray, x_dtype) -> jnp.ndarray:
    """Store weights in bf16 when exact (e.g. power-of-two strides) or x is bf16."""
    if x_dtype == jnp.bfloat16:
        return jnp.asarray(w_np, dtype=jnp.bfloat16)
    try:
        import ml_dtypes
        wb = w_np.astype(ml_dtypes.bfloat16)
        if np.array_equal(wb.astype(np.float32), w_np):
            return jnp.asarray(wb)                 # bit-exact: halve weight HBM/VMEM
    except Exception:
        pass
    return jnp.asarray(w_np, dtype=np.float32)


# ---------------------------------------------------------------------------
# VMEM accounting / tiling helpers
# ---------------------------------------------------------------------------
def _vmem_capacity_bytes() -> int:
    try:
        cap = getattr(pltpu.get_tpu_info(), "vmem_capacity_bytes", None)
        if cap:
            return int(cap)
    except Exception:
        pass
    return 64 * 1024 * 1024                        # conservative (v7x per-core VMEM)


def _padded_tile_bytes(rows: int, cols: int, itemsize: int) -> int:
    """Bytes of a (rows, cols) VMEM tile after (sublane, 128-lane) padding."""
    sub = {4: 8, 2: 16, 1: 32}.get(itemsize, 8)
    pr = -(-rows // sub) * sub
    pc = -(-cols // 128) * 128
    return pr * pc * itemsize


def _pick_tc(nc: int, fits_fn, prefer_grid: int = 4) -> int:
    """Planes per grid step.

    Preference order: fits the VMEM budget, grid length >= 2 (pipelining +
    v7x megacore), sublane-aligned block (tc % 8 == 0 or tc == nc), grid
    length an even number >= `prefer_grid`, then the largest tc.
    """
    if not fits_fn(1):
        return 1                                   # even one plane busts the budget
    best_d, best_key = 1, None
    for d in range(1, nc + 1):
        if nc % d:
            continue
        g = nc // d
        fits = fits_fn(d)
        key = (fits,
               g >= 2,
               (d % 8 == 0) or (d == nc),
               (g >= prefer_grid) and (g % 2 == 0),
               d if fits else -d)
        if best_key is None or key > best_key:
            best_d, best_key = d, key
    return best_d


# ---------------------------------------------------------------------------
# Kernels
# ---------------------------------------------------------------------------
def _kron_upsample_kernel(x_ref, kt_ref, o_ref):
    # x_ref : (1, TC, H*W)     lane-dense input planes
    # kt_ref: (H*W, Ho*Wo)     fused (Kronecker) interpolation matrix, K^T
    # o_ref : (1, TC, Ho*Wo)   lane-dense output planes
    x = x_ref[0]                                   # (TC, H*W)
    kt = kt_ref[...]
    if kt.dtype != x.dtype:
        kt = kt.astype(x.dtype)                    # exact bf16 -> f32 upcast
    res = jnp.dot(x, kt, preferred_element_type=jnp.float32)      # (TC, Ho*Wo)
    o_ref[0] = res.astype(o_ref.dtype)


def _separable_upsample_kernel(x_ref, wh_ref, wwt_ref, o_ref):
    # x_ref  : (TC, H, W)
    # wh_ref : (Ho, H)     H-direction interpolation matrix
    # wwt_ref: (W, Wo)     W-direction matrix, transpose hoisted to the host
    # o_ref  : (TC, Ho, Wo)
    tc, h, w = x_ref.shape
    wo = wwt_ref.shape[1]
    x = x_ref[...]
    wwt = wwt_ref[...]
    if wwt.dtype != x.dtype:
        wwt = wwt.astype(x.dtype)
    # W-direction first: one flat MXU matmul with M = TC*H, N = Wo.
    y = jnp.dot(x.reshape(tc * h, w), wwt,
                preferred_element_type=jnp.float32)               # (TC*H, Wo)
    y = y.reshape(tc, h, wo)
    # H-direction: batched contraction directly on Wh (no broadcast_to).
    out = jnp.einsum('oh,chv->cov', wh_ref[...].astype(jnp.float32), y,
                     preferred_element_type=jnp.float32)          # (TC, Ho, Wo)
    o_ref[...] = out.astype(o_ref.dtype)


# ---------------------------------------------------------------------------
# Wrapper
# ---------------------------------------------------------------------------
def basic_us_block2(x: jnp.ndarray, stride: int = 2) -> jnp.ndarray:
    """Bilinear upsample (scale_factor=stride, align_corners=False), NCHW."""
    N, C, H, W = x.shape
    s = int(stride)
    Ho, Wo = H * s, W * s
    nc = N * C
    HW, HoWo = H * W, Ho * Wo
    x_itemsize = x.dtype.itemsize

    cap = _vmem_capacity_bytes()
    vmem_limit = int(cap * 0.65)                       # headroom vs physical VMEM
    budget = min(int(cap * 0.45), 48 * 1024 * 1024)    # block-sizing budget

    wh_np = _bilinear_matrix_np(Ho, H, float(s))       # (Ho, H)
    ww_np = _bilinear_matrix_np(Wo, W, float(s))       # (Wo, W)

    # ---- Fused (Kronecker) path for small planes: one lane-dense MXU matmul.
    use_kron = (HW <= 2048) and (HW * HoWo * 4 <= 4 * 1024 * 1024)
    if use_kron:
        kron_np = np.kron(wh_np, ww_np).T.astype(np.float32)      # (H*W, Ho*Wo)
        kt = _maybe_bf16(kron_np, x.dtype)
        kron_w_bytes = _padded_tile_bytes(HW, HoWo, kt.dtype.itemsize)

        def fits(tc):
            b = 2 * _padded_tile_bytes(tc, HW, x_itemsize)        # input (dbl-buf)
            b += 2 * _padded_tile_bytes(tc, HoWo, x_itemsize)     # output (dbl-buf)
            b += _padded_tile_bytes(tc, HoWo, 4)                  # f32 acc temp
            b += 2 * kron_w_bytes                                 # weight buffers
            return b <= budget

        tc = _pick_tc(nc, fits)
        g = nc // tc
        x_blk = x.reshape(g, tc, HW)                              # free reinterpretation

        out = pl.pallas_call(
            _kron_upsample_kernel,
            out_shape=jax.ShapeDtypeStruct((g, tc, HoWo), x.dtype),
            grid_spec=pltpu.PrefetchScalarGridSpec(
                num_scalar_prefetch=0,
                grid=(g,),
                in_specs=[
                    pl.BlockSpec((1, tc, HW), lambda i: (i, 0, 0)),
                    pl.BlockSpec((HW, HoWo), lambda i: (0, 0)),   # resident weight
                ],
                out_specs=pl.BlockSpec((1, tc, HoWo), lambda i: (i, 0, 0)),
            ),
            compiler_params=pltpu.CompilerParams(
                dimension_semantics=("parallel",),
                vmem_limit_bytes=vmem_limit,
            ),
        )(x_blk, kt)
        return out.reshape(N, C, Ho, Wo)                          # contiguous, free

    # ---- Separable path for larger planes: (x @ Ww^T) then Wh contraction.
    # TODO(synk): for very large planes (H,W >~ 300-400) switch to a 2-tap
    # lerp/banded formulation to avoid the dense-matrix MAC inflation making
    # the kernel MXU-bound (matters most on v5e / per-TC v7x).
    wh = _maybe_bf16(wh_np, x.dtype)                              # (Ho, H)
    wwt = _maybe_bf16(np.ascontiguousarray(ww_np.T), x.dtype)     # (W, Wo)
    w_itemsize = wh.dtype.itemsize

    def fits(tc):
        b = 2 * tc * _padded_tile_bytes(H, W, x_itemsize)         # input (dbl-buf)
        b += 2 * tc * _padded_tile_bytes(Ho, Wo, x_itemsize)      # output (dbl-buf)
        b += _padded_tile_bytes(tc * H, Wo, 4)                    # y intermediate (f32)
        b += 2 * tc * _padded_tile_bytes(Ho, Wo, 4)               # f32 result + transpose temp
        b += 2 * (_padded_tile_bytes(Ho, H, w_itemsize)
                  + _padded_tile_bytes(W, Wo, w_itemsize))        # weights
        return b <= budget

    tc = _pick_tc(nc, fits)
    x_blk = x.reshape(nc, H, W)

    out = pl.pallas_call(
        _separable_upsample_kernel,
        out_shape=jax.ShapeDtypeStruct((nc, Ho, Wo), x.dtype),
        grid_spec=pltpu.PrefetchScalarGridSpec(
            num_scalar_prefetch=0,
            grid=(nc // tc,),
            in_specs=[
                pl.BlockSpec((tc, H, W), lambda i: (i, 0, 0)),
                pl.BlockSpec((Ho, H), lambda i: (0, 0)),
                pl.BlockSpec((W, Wo), lambda i: (0, 0)),
            ],
            out_specs=pl.BlockSpec((tc, Ho, Wo), lambda i: (i, 0, 0)),
        ),
        compiler_params=pltpu.CompilerParams(
            dimension_semantics=("parallel",),
            vmem_limit_bytes=vmem_limit,
        ),
    )(x_blk, wh, wwt)
    return out.reshape(N, C, Ho, Wo)


if __name__ == "__main__":
    key = jax.random.PRNGKey(0)
    N, C, H, W = 2, 4, 16, 16
    stride = 2
    x = jax.random.normal(key, (N, C, H, W), dtype=jnp.float32)

    out = basic_us_block2(x, stride=stride)
    out = jax.block_until_ready(out)

    assert out.shape == (N, C, H * stride, W * stride), out.shape
    assert bool(jnp.all(jnp.isfinite(out)))

    # Pure-JAX reference (same PyTorch align_corners=False bilinear semantics).
    wh = jnp.asarray(_bilinear_matrix_np(H * stride, H, float(stride)))
    ww = jnp.asarray(_bilinear_matrix_np(W * stride, W, float(stride)))
    ref = jnp.einsum('oh,nchw,vw->ncov', wh, x, ww)
    assert bool(jnp.allclose(out, ref, atol=1e-5, rtol=1e-5))

    print("KERNEL_OK")
</pallas_src>

<mosaic_0001>
module attributes {stable_mosaic.version = 11 : i64} {
  func.func @_kron_upsample_kernel(%arg0: i32, %arg1: memref<1x2x256xf32, #tpu.memory_space<vmem>>, %arg2: memref<256x1024xbf16, #tpu.memory_space<vmem>>, %arg3: memref<1x2x1024xf32, #tpu.memory_space<vmem>>) attributes {dimension_semantics = [#tpu.dimension_semantics<parallel>], iteration_bounds = array<i64: 4>, scalar_prefetch = 0 : i64, scratch_operands = 0 : i64, tpu.core_type = #tpu.core_type<tc>, window_params = [{transform_indices = @transform_0, window_bounds = array<i64: 1, 2, 256>}, {pipeline_mode = #tpu.pipeline_mode<synchronous>, transform_indices = @transform_1, window_bounds = array<i64: 256, 1024>}, {transform_indices = @transform_2, window_bounds = array<i64: 1, 2, 1024>}]} {
    %c0 = arith.constant 0 : index
    %c0_0 = arith.constant 0 : index
    %c0_1 = arith.constant 0 : index
    %0 = vector.load %arg1[%c0, %c0_0, %c0_1] : memref<1x2x256xf32, #tpu.memory_space<vmem>>, vector<1x2x256xf32>
    %1 = vector.shape_cast %0 : vector<1x2x256xf32> to vector<2x256xf32>
    %c0_2 = arith.constant 0 : index
    %c0_3 = arith.constant 0 : index
    %2 = vector.load %arg2[%c0_2, %c0_3] : memref<256x1024xbf16, #tpu.memory_space<vmem>>, vector<256x1024xbf16>
    %3 = arith.extf %2 : vector<256x1024xbf16> to vector<256x1024xf32>
    %cst = arith.constant dense<0.000000e+00> : vector<2x1024xf32>
    %4 = tpu.matmul %1, %3, %cst {dimension_numbers = #tpu.dot_dimension_numbers<[1], [0], [0], [1], [0, 0, 1, 1], [], []>} : vector<2x256xf32>, vector<256x1024xf32>, vector<2x1024xf32> -> vector<2x1024xf32>
    %c0_4 = arith.constant 0 : index
    %c0_5 = arith.constant 0 : index
    %c0_6 = arith.constant 0 : index
    %5 = vector.load %arg3[%c0_4, %c0_5, %c0_6] : memref<1x2x1024xf32, #tpu.memory_space<vmem>>, vector<1x2x1024xf32>
    %6 = vector.shape_cast %5 : vector<1x2x1024xf32> to vector<2x1024xf32>
    %7 = vector.shape_cast %4 : vector<2x1024xf32> to vector<1x2x1024xf32>
    tpu.vector_store %arg3[%c0_4, %c0_5, %c0_6], %7 {strides = array<i32>} : memref<1x2x1024xf32, #tpu.memory_space<vmem>>, vector<1x2x1024xf32>,
    return
  }
  func.func @transform_0(%arg0: i32) -> (i32, i32, i32) {
    %c0_i32 = arith.constant 0 : i32
    %c0_i32_0 = arith.constant 0 : i32
    %c0_i32_1 = arith.constant 0 : i32
    return %arg0, %c0_i32, %c0_i32_0 : i32, i32, i32
  }
  func.func @transform_1(%arg0: i32) -> (i32, i32) {
    %c0_i32 = arith.constant 0 : i32
    %c0_i32_0 = arith.constant 0 : i32
    %c0_i32_1 = arith.constant 0 : i32
    return %c0_i32, %c0_i32_0 : i32, i32
  }
  func.func @transform_2(%arg0: i32) -> (i32, i32, i32) {
    %c0_i32 = arith.constant 0 : i32
    %c0_i32_0 = arith.constant 0 : i32
    %c0_i32_1 = arith.constant 0 : i32
    return %arg0, %c0_i32, %c0_i32_0 : i32, i32, i32
  }
}

</mosaic_0001>

<bundles_post_ra>
// kernel: tpu_custom_call.1
= control target key start
LH: loop header
LB: loop body
LE: loop exit
PB: predicated region body
PF: predicated region fallthrough
CT: control target
= control target key end

     0   :  { %7 = vsyncpa [#allocation3], 0  ;;  %s1815_s0 = inlined_call_operand.hbm [shape: f32[4,2,256], index: 0, kind: input, shape index: {}]   ;;  %s1816_s1 = inlined_call_operand.hbm [shape: bf16[256,1024], index: 1, kind: input, shape index: {}]   ;;  %s1817_s2 = inlined_call_operand.hbm [shape: f32[4,2,1024], index: 2, kind: output, shape index: {}]  }
   0x1   :  { %9 = vsyncpa [#allocation3 + $0x1], 0 }
   0x2   :  { %10 = vsyncpa [#allocation6], 0 }
   0x3   :  { %11 = vsyncpa [#allocation4], 0 }
   0x4   :  { %13 = vsyncpa [#allocation4 + $0x1], 0  ;;  %s1610_s9 = smov 0   ;;  %s1612_s10 = smov 0  }
   0x5   :  { %s1614_s11 = smov 0   ;;  %s1616_s12 = smov 0  }
   0x6 LB: > { %s1631_s13 = sadd.s32 4294967295, %s1587_s12   ;;  %s996_s14 = sadd.s32 4294967294, %s1587_s12   ;;  %s1587_s12 = sphi %s1616_s12, %s1836_s12   ;;  %s1583_s11 = sphi %s1614_s11, %s1835_s11   ;;  %s1579_s10 = sphi %s1612_s10, %s1834_s10   ;;  %s1575_s9 = sphi %s1610_s9, %s1833_s9  }
   0x7   : > { %p39_p0 = scmp.ne.s32.totalorder %s1579_s10, %s1575_s9  ;;  %p1818_p1 = scmp.eq.s32.totalorder %s1631_s13, 0 }
   0x8   : > { %p90_p3 = scmp.eq.s32.totalorder %s996_s14, 3  ;;  %p997_p5 = scmp.ge.s32.totalorder %s1587_s12, 1 }
   0x9   : > { %p1640_p4 = por %p1818_p1, %p39_p0  ;;  %p97_p7 = scmp.lt.s32.totalorder %s1587_s12, 5 }
   0xa   : > { %p1645_p6 = por %p90_p3, %p39_p0  ;;  %s1589_s18 = smov [#allocation5]  }
   0xb   : > { %s1821_s15 = scalar_select %p1640_p4, 1, 0 }
   0xc   : > { %s1822_s16 = scalar_select %p1645_p6, 1, 0 }
   0xd   : > { %p1650_p8 = pnand %p997_p5, %p97_p7  ;;  %s109_s19 = sshll.u32 %s1589_s18, 4  ;;  %s110_s19 = int_to_ptr.vmem [resolvable:$true] %s109_s19 }
   0xe   : > { %s1663_s21 = sadd.s32 1, %s1587_s12   ;;  %s26_s22 = sadd.s32 1, %s1583_s11 }
   0xf   : > { %s1823_s17 = scalar_select %p1650_p8, 1, 0 }
  0x10   : > { %p1407_p9 = pneg %p1650_p8  ;;  %s23_s23 = ssub.s32 %s1587_s12, %s1663_s21 }
  0x11   : > { %s1459_s26 = scalar_lea.hbm %s1816_s1, 16384 }
  0x12   : > { %p1658_p10 = pnand %p1407_p9, %p1818_p1  ;;  %p1460_p11 = scmp.ne.s32.totalorder %s1816_s1, %s1459_s26 }
  0x13   : > { %p1466_p3 = scmp.lt.u32.totalorder %s1459_s26, %s1816_s1 }
  0x14   : > { %p1461_p12 = pneg %p1658_p10 }
  0x16   : > { %p1462_p13 = pnand %p1461_p12, %p1460_p11 }
  0x18   : > { %p1463_p0 = pneg %p1462_p13 }
  0x1a   : > { %p1468_p5 = pnand %p1466_p3, %p1463_p0 }
  0x1c   : > { %1471 = shalt.err (!%p1468_p5)
}
  0x1d   : > { %s1472_s3 = scalar_lea.vmem %s110_s19, 16384  ;;  %p1480_p2 = scmp.lt.s32.totalorder %s110_s19, %s110_s19 }
  0x1e   : > { %p1473_p7 = scmp.ne.s32.totalorder %s110_s19, %s1472_s3  ;;  %p1481_p6 = scmp.lt.s32.totalorder %s1472_s3, %s1472_s3 }
  0x20   : > { %p1475_p9 = pnand %p1473_p7, %p1461_p12  ;;  %p1482_p4 = por %p1481_p6, %p1480_p2 }
  0x22   : > { %p1476_p1 = pneg %p1475_p9 }
  0x24   : > { %p1483_p8 = pnand %p1482_p4, %p1476_p1 }
  0x26   : > { %1486 = shalt.err (!%p1483_p8)
}
  0x27   : > { %s1590_s4 = smov 512   ;;  %s1591_s5 = smov 32  }
  0x28   : > { %1410 = dma.hbm_to_vmem [thread:$0]  (!%p1658_p10), %s1816_s1, 16384, %s110_s19, [#allocation6], %s1590_s4, %s1590_s4, %s1591_s5  }
  0x29   : > { %p24_p11 = scmp.eq.s32.totalorder %s23_s23, 0  ;;  %p33_p2 = scmp.ne.s32.totalorder %s1583_s11, %s1579_s10 }
  0x2a   : > { %p34_p1 = scmp.eq.s32.totalorder %s1587_s12, 0  ;;  %p1420_p4 = scmp.lt.s32.totalorder %s1587_s12, 4 }
  0x2b   : > { %s1689_s8 = scalar_select %p24_p11, %s1583_s11, %s26_s22  }
  0x2c   : > { %p35_p6 = por %p34_p1, %p33_p2  ;;  %p1825_p8 = scmp.eq.s32.totalorder %s1631_s13, 3 }
  0x2d   : > { %s123_s18 = sand.u32 1, %s1583_s11   ;;  %s1013_s24 = sshll.u32 %s1587_s12, 6 }
  0x2e   : > { %p1693_p12 = por %p1825_p8, %p33_p2  ;;  %s1000_s25 = sshll.u32 %s123_s18, 2 }
  0x2f   : > { %s1702_s27 = scalar_lea.hbm %s1815_s0, %s1013_s24  ;;  %s127_s19 = scalar_lea.vmem [#allocation2], %s1000_s25 }
  0x30   : > { %s135_s22 = sshll.u32 %s127_s19, 4  ;;  %p1704_p10 = pnand %p1420_p4, %p35_p6  ;;  %s1708_s22 = int_to_ptr.vmem [resolvable:$true] %s135_s22 }
  0x31   : > { %s124_s28 = scalar_lea.sflag [#allocation3], %s123_s18  ;;  %s1487_s29 = scalar_lea.hbm %s1702_s27, 64 }
  0x32   : > { %p1488_p13 = scmp.ne.s32.totalorder %s1702_s27, %s1487_s29  ;;  %p1489_p0 = pneg %p1704_p10 }
  0x33   : > { %s1492_s4 = scalar_lea.hbm %s1815_s0, 256  ;;  %p1493_p7 = scmp.lt.u32.totalorder %s1702_s27, %s1815_s0 }
  0x34   : > { %p1490_p3 = pnand %p1489_p0, %p1488_p13  ;;  %p1494_p9 = scmp.lt.u32.totalorder %s1492_s4, %s1487_s29 }
  0x35   : > { %p1496_p2 = scmp.lt.u32.totalorder %s1487_s29, %s1702_s27 }
  0x36   : > { %p1491_p5 = pneg %p1490_p3  ;;  %p1495_p11 = por %p1494_p9, %p1493_p7 }
  0x38   : > { %p1497_p1 = por %p1496_p2, %p1495_p11 }
  0x3a   : > { %p1498_p4 = pnand %p1497_p1, %p1491_p5 }
  0x3c   : > { %1501 = shalt.err (!%p1498_p4)
}
  0x3d   : > { %s1502_s7 = scalar_lea.vmem %s1708_s22, 64  ;;  %s1592_s18 = smov [#allocation2]  }
  0x3e   : > { %p1503_p6 = scmp.ne.s32.totalorder %s1708_s22, %s1502_s7  ;;  %s1507_s24 = sshll.u32 %s1592_s18, 4  ;;  %s1508_s24 = int_to_ptr.vmem [resolvable:$false] %s1507_s24 }
  0x3f   : > { %s1509_s25 = scalar_lea.vmem %s1508_s24, 128  ;;  %p1510_p3 = scmp.lt.s32.totalorder %s1708_s22, %s1508_s24 }
  0x40   : > { %p1505_p8 = pnand %p1503_p6, %p1489_p0  ;;  %p1511_p7 = scmp.lt.s32.totalorder %s1509_s25, %s1502_s7 }
  0x42   : > { %p1506_p13 = pneg %p1505_p8  ;;  %p1512_p9 = por %p1511_p7, %p1510_p3 }
  0x44   : > { %p1513_p11 = pnand %p1512_p9, %p1506_p13 }
  0x46   : > { %1516 = shalt.err (!%p1513_p11)
}
  0x47   : > { %1414 = dma.hbm_to_vmem [thread:$0]  (!%p1704_p10), %s1702_s27, 64, %s1708_s22, %s124_s28  }
  0x48   : > { %p1828_p5 = scmp.ne.s32.totalorder %s1823_s17, 0 }
  0x49   : > { %s1738_s20 = sand.u32 (!%p1828_p5), 1, %s1579_s10   ;;  %p1829_p0 = scmp.ne.s32.totalorder (!%p1828_p5), %s1821_s15, 0 }
  0x4a   : > { %144 = sbr.rel (%p1828_p5) target bundleno = 450 (0x1c2), region = 28  ;;  %s1004_s26 = sshll.u32 (!%p1828_p5), %s1738_s20, 2 }
  0x4b   : > { %s147_s19 = scalar_lea.sflag (!%p1828_p5), [#allocation3], %s1738_s20  ;;  %s1742_s29 = scalar_lea.vmem (!%p1828_p5), [#allocation2], %s1004_s26 }
  0x51   : > { %1562 = dma.done.wait (%p1829_p0), %s147_s19, 64  }
  0x52   : > { %1564 = vsyncadd (%p1829_p0), %s147_s19, 4294967232  ;;  %p1830_p10 = scmp.eq.s32.totalorder %s1631_s13, 0 }
  0x54   : > { %1566 = dma.done.wait (%p1830_p10), [#allocation6], 16384   ;;  %p1831_p2 = pmov %p1830_p10 }
  0x55   : > { %v176_v0 = vld [vmem:[#allocation5] sm:$0xff]  ;;  %v177_v2 = vld [vmem:[#allocation5 + $0x8] sm:$0xff]  ;;  %v1753_v53 = vld.sshfl [vmem:[%s1742_s29] sm:$0x33 pattern:$0x76325410] }
  0x56   : > { %1568 = vsyncadd (%p1831_p2), [#allocation6], 4294950912  ;;  %v180_v1 = vld [vmem:[#allocation5 + $0x20] sm:$0xff]  ;;  %v181_v4 = vld [vmem:[#allocation5 + $0x28] sm:$0xff]  ;;  %v1757_v57 = vcombine.high %v1753_v53, %v1753_v53  ;;  %s1006_s15 = sshll.u32 %s1738_s20, 4  ;;  %s1014_s27 = sshll.u32 %s1631_s13, 8 }
  0x57   : > { %v1271_v3 = vcombine.high %v176_v0, %v180_v1  ;;  %v1272_v5 = vcombine.low %v176_v0, %v180_v1  ;;  %v184_v6 = vld [vmem:[#allocation5 + $0x40] sm:$0xff]  ;;  %v1303_v8 = vcombine.high %v177_v2, %v181_v4  ;;  %v1304_v9 = vcombine.low %v177_v2, %v181_v4  ;;  %v185_v11 = vld [vmem:[#allocation5 + $0x48] sm:$0xff]  ;;  %s174_s17 = scalar_lea.vmem [#allocation7], %s1006_s15  ;;  %s1772_s30 = scalar_lea.hbm %s1817_s2, %s1014_s27 }
  0x58   : > { %v188_v7 = vld [vmem:[#allocation5 + $0x60] sm:$0xff]  ;;  %v189_v12 = vld [vmem:[#allocation5 + $0x68] sm:$0xff]  ;;  %635 = vmatprep.mubr.f32.mxu0 %v1757_v57  ;;  %706 = vmatprep.mubr.f32.mxu1 %v1757_v57  ;;  %s916_s22 = sshll.u32 %s174_s17, 4  ;;  %s902_s3 = scalar_lea.sflag [#allocation4], %s1738_s20  ;;  %s1774_s22 = int_to_ptr.vmem [resolvable:$true] %s916_s22 }
  0x59   : > { %v1273_v10 = vcombine.high %v184_v6, %v188_v7  ;;  %v192_v13 = vld [vmem:[#allocation5 + $0x80] sm:$0xff]  ;;  %1016 = vmatprep.subr.bf16.mxu0 %v1271_v3  ;;  %v1305_v14 = vcombine.high %v185_v11, %v189_v12  ;;  %v193_v16 = vld [vmem:[#allocation5 + $0x88] sm:$0xff]  ;;  %1080 = vmatprep.subr.bf16.mxu1 %v1303_v8  ;;  %v1274_v18 = vcombine.low %v184_v6, %v188_v7  ;;  %s1517_s4 = scalar_lea.vmem %s1774_s22, 256  ;;  %s1594_s13 = smov [#allocation7]  }
  0x5a   : > { %v196_v15 = vld [vmem:[#allocation5 + $0xa0] sm:$0xff]  ;;  %v197_v17 = vld [vmem:[#allocation5 + $0xa8] sm:$0xff]  ;;  %1018 = vmatpush1.bf16.msra.mxu0 %v1272_v5  ;;  %1082 = vmatpush1.bf16.msra.mxu1 %v1304_v9  ;;  %v1306_v19 = vcombine.low %v185_v11, %v189_v12  ;;  %p1518_p1 = scmp.ne.s32.totalorder %s1774_s22, %s1517_s4  ;;  %s1521_s5 = sshll.u32 %s1594_s13, 4  ;;  %s1522_s5 = int_to_ptr.vmem [resolvable:$false] %s1521_s5 }
  0x5b   : > { %1020 = vmatprep.subr.bf16.mxu0 %v1273_v10  ;;  %v1275_v20 = vcombine.high %v192_v13, %v196_v15  ;;  %1084 = vmatprep.subr.bf16.mxu1 %v1305_v14  ;;  %v1307_v21 = vcombine.high %v193_v16, %v197_v17  ;;  %v200_v22 = vld [vmem:[#allocation5 + $0xc0] sm:$0xff]  ;;  %v201_v24 = vld [vmem:[#allocation5 + $0xc8] sm:$0xff]  ;;  %v1276_v26 = vcombine.low %v192_v13, %v196_v15  ;;  %s1523_s6 = scalar_lea.vmem %s1522_s5, 512  ;;  %p1524_p8 = scmp.lt.s32.totalorder %s1774_s22, %s1522_s5 }
  0x5c   : > { %v204_v23 = vld [vmem:[#allocation5 + $0xe0] sm:$0xff]  ;;  %v205_v25 = vld [vmem:[#allocation5 + $0xe8] sm:$0xff]  ;;  %v1308_v27 = vcombine.low %v193_v16, %v197_v17  ;;  %p1519_p4 = pnand %p1518_p1, %p1693_p12  ;;  %p1525_p13 = scmp.lt.s32.totalorder %s1523_s6, %s1517_s4 }
  0x5d   : > { %v1277_v28 = vcombine.high %v200_v22, %v204_v23  ;;  %v1309_v29 = vcombine.high %v201_v24, %v205_v25  ;;  %v208_v30 = vld [vmem:[#allocation5 + $0x100] sm:$0xff]  ;;  %v209_v32 = vld [vmem:[#allocation5 + $0x108] sm:$0xff]  ;;  %v1278_v34 = vcombine.low %v200_v22, %v204_v23  ;;  %v1310_v35 = vcombine.low %v201_v24, %v205_v25 }
  0x5e   : > { %1022 = vmatpush1.bf16.msra.mxu0 %v1274_v18  ;;  %1086 = vmatpush1.bf16.msra.mxu1 %v1306_v19  ;;  %v212_v31 = vld [vmem:[#allocation5 + $0x120] sm:$0xff]  ;;  %v213_v33 = vld [vmem:[#allocation5 + $0x128] sm:$0xff]  ;;  %p1520_p6 = pneg %p1519_p4  ;;  %p1526_p3 = por %p1525_p13, %p1524_p8 }
  0x5f   : > { %1024 = vmatprep.subr.bf16.mxu0 %v1275_v20  ;;  %1088 = vmatprep.subr.bf16.mxu1 %v1307_v21  ;;  %v1279_v36 = vcombine.high %v208_v30, %v212_v31  ;;  %v1311_v37 = vcombine.high %v209_v32, %v213_v33  ;;  %v216_v38 = vld [vmem:[#allocation5 + $0x140] sm:$0xff]  ;;  %v217_v40 = vld [vmem:[#allocation5 + $0x148] sm:$0xff]  ;;  %v1280_v42 = vcombine.low %v208_v30, %v212_v31 }
  0x60   : > { %v220_v39 = vld [vmem:[#allocation5 + $0x160] sm:$0xff]  ;;  %v221_v41 = vld [vmem:[#allocation5 + $0x168] sm:$0xff]  ;;  %v1312_v43 = vcombine.low %v209_v32, %v213_v33  ;;  %p1527_p7 = pnand %p1526_p3, %p1520_p6 }
  0x61   : > { %v1281_v44 = vcombine.high %v216_v38, %v220_v39  ;;  %v1313_v45 = vcombine.high %v217_v40, %v221_v41  ;;  %v224_v46 = vld [vmem:[#allocation5 + $0x180] sm:$0xff]  ;;  %v225_v48 = vld [vmem:[#allocation5 + $0x188] sm:$0xff]  ;;  %v1282_v50 = vcombine.low %v216_v38, %v220_v39  ;;  %v1314_v51 = vcombine.low %v217_v40, %v221_v41 }
  0x62   : > { %1026 = vmatpush1.bf16.msra.mxu0 %v1276_v26  ;;  %1090 = vmatpush1.bf16.msra.mxu1 %v1308_v27  ;;  %v228_v47 = vld [vmem:[#allocation5 + $0x1a0] sm:$0xff]  ;;  %v229_v49 = vld [vmem:[#allocation5 + $0x1a8] sm:$0xff] }
  0x63   : > { %1028 = vmatprep.subr.bf16.mxu0 %v1277_v28  ;;  %1092 = vmatprep.subr.bf16.mxu1 %v1309_v29  ;;  %v1283_v52 = vcombine.high %v224_v46, %v228_v47  ;;  %v1315_v54 = vcombine.high %v225_v48, %v229_v49  ;;  %v232_v55 = vld [vmem:[#allocation5 + $0x1c0] sm:$0xff]  ;;  %v233_v58 = vld [vmem:[#allocation5 + $0x1c8] sm:$0xff]  ;;  %v1284_v60 = vcombine.low %v224_v46, %v228_v47 }
  0x64   : > { %v236_v56 = vld [vmem:[#allocation5 + $0x1e0] sm:$0xff]  ;;  %v237_v59 = vld [vmem:[#allocation5 + $0x1e8] sm:$0xff]  ;;  %v1316_v61 = vcombine.low %v225_v48, %v229_v49 }
  0x65   : > { %v1285_v62 = vcombine.high %v232_v55, %v236_v56  ;;  %v1317_v63 = vcombine.high %v233_v58, %v237_v59  ;;  %v240_v0 = vld [vmem:[#allocation5 + $0x200] sm:$0xff]  ;;  %v241_v2 = vld [vmem:[#allocation5 + $0x208] sm:$0xff]  ;;  %v1286_v4 = vcombine.low %v232_v55, %v236_v56  ;;  %v1318_v5 = vcombine.low %v233_v58, %v237_v59 }
  0x66   : > { %1030 = vmatpush1.bf16.msra.mxu0 %v1278_v34  ;;  %1094 = vmatpush1.bf16.msra.mxu1 %v1310_v35  ;;  %v244_v1 = vld [vmem:[#allocation5 + $0x220] sm:$0xff]  ;;  %v245_v3 = vld [vmem:[#allocation5 + $0x228] sm:$0xff] }
  0x67   : > { %1032 = vmatprep.subr.bf16.mxu0 %v1279_v36  ;;  %1096 = vmatprep.subr.bf16.mxu1 %v1311_v37  ;;  %v1287_v6 = vcombine.high %v240_v0, %v244_v1  ;;  %v1319_v7 = vcombine.high %v241_v2, %v245_v3  ;;  %v248_v8 = vld [vmem:[#allocation5 + $0x240] sm:$0xff]  ;;  %v249_v10 = vld [vmem:[#allocation5 + $0x248] sm:$0xff]  ;;  %v1288_v12 = vcombine.low %v240_v0, %v244_v1 }
  0x68   : > { %v252_v9 = vld [vmem:[#allocation5 + $0x260] sm:$0xff]  ;;  %v253_v11 = vld [vmem:[#allocation5 + $0x268] sm:$0xff]  ;;  %v1320_v13 = vcombine.low %v241_v2, %v245_v3  ;;  %v178_v2 = vld [vmem:[#allocation5 + $0x10] sm:$0xff] }
  0x69   : > { %v1289_v14 = vcombine.high %v248_v8, %v252_v9  ;;  %v1321_v15 = vcombine.high %v249_v10, %v253_v11  ;;  %v256_v16 = vld [vmem:[#allocation5 + $0x280] sm:$0xff]  ;;  %v257_v18 = vld [vmem:[#allocation5 + $0x288] sm:$0xff]  ;;  %v1290_v20 = vcombine.low %v248_v8, %v252_v9  ;;  %v1322_v21 = vcombine.low %v249_v10, %v253_v11  ;;  %v182_v3 = vld [vmem:[#allocation5 + $0x30] sm:$0xff] }
  0x6a   : > { %1034 = vmatpush1.bf16.msra.mxu0 %v1280_v42  ;;  %1098 = vmatpush1.bf16.msra.mxu1 %v1312_v43  ;;  %v260_v17 = vld [vmem:[#allocation5 + $0x2a0] sm:$0xff]  ;;  %v261_v19 = vld [vmem:[#allocation5 + $0x2a8] sm:$0xff]  ;;  %v1335_v8 = vcombine.high %v178_v2, %v182_v3  ;;  %v186_v10 = vld [vmem:[#allocation5 + $0x50] sm:$0xff] }
  0x6b   : > { %1036 = vmatprep.subr.bf16.mxu0 %v1281_v44  ;;  %1100 = vmatprep.subr.bf16.mxu1 %v1313_v45  ;;  %v1291_v22 = vcombine.high %v256_v16, %v260_v17  ;;  %v1323_v23 = vcombine.high %v257_v18, %v261_v19  ;;  %v264_v24 = vld [vmem:[#allocation5 + $0x2c0] sm:$0xff]  ;;  %v265_v26 = vld [vmem:[#allocation5 + $0x2c8] sm:$0xff]  ;;  %v1292_v28 = vcombine.low %v256_v16, %v260_v17  ;;  %v190_v11 = vld [vmem:[#allocation5 + $0x70] sm:$0xff] }
  0x6c   : > { %v268_v25 = vld [vmem:[#allocation5 + $0x2e0] sm:$0xff]  ;;  %v269_v27 = vld [vmem:[#allocation5 + $0x2e8] sm:$0xff]  ;;  %v1324_v29 = vcombine.low %v257_v18, %v261_v19  ;;  %v1337_v16 = vcombine.high %v186_v10, %v190_v11  ;;  %v194_v18 = vld [vmem:[#allocation5 + $0x90] sm:$0xff] }
  0x6d   : > { %v1293_v30 = vcombine.high %v264_v24, %v268_v25  ;;  %v1325_v31 = vcombine.high %v265_v26, %v269_v27  ;;  %v272_v32 = vld [vmem:[#allocation5 + $0x300] sm:$0xff]  ;;  %v273_v34 = vld [vmem:[#allocation5 + $0x308] sm:$0xff]  ;;  %v1294_v36 = vcombine.low %v264_v24, %v268_v25  ;;  %v1326_v37 = vcombine.low %v265_v26, %v269_v27  ;;  %v198_v19 = vld [vmem:[#allocation5 + $0xb0] sm:$0xff] }
  0x6e   : > { %1038 = vmatpush1.bf16.msra.mxu0 %v1282_v50  ;;  %1102 = vmatpush1.bf16.msra.mxu1 %v1314_v51  ;;  %v276_v33 = vld [vmem:[#allocation5 + $0x320] sm:$0xff]  ;;  %v277_v35 = vld [vmem:[#allocation5 + $0x328] sm:$0xff]  ;;  %v1339_v24 = vcombine.high %v194_v18, %v198_v19  ;;  %v202_v26 = vld [vmem:[#allocation5 + $0xd0] sm:$0xff] }
  0x6f   : > { %1040 = vmatprep.subr.bf16.mxu0 %v1283_v52  ;;  %1104 = vmatprep.subr.bf16.mxu1 %v1315_v54  ;;  %v1295_v38 = vcombine.high %v272_v32, %v276_v33  ;;  %v1327_v39 = vcombine.high %v273_v34, %v277_v35  ;;  %v280_v40 = vld [vmem:[#allocation5 + $0x340] sm:$0xff]  ;;  %v281_v42 = vld [vmem:[#allocation5 + $0x348] sm:$0xff]  ;;  %v1296_v44 = vcombine.low %v272_v32, %v276_v33  ;;  %v206_v27 = vld [vmem:[#allocation5 + $0xf0] sm:$0xff] }
  0x70   : > { %v284_v41 = vld [vmem:[#allocation5 + $0x360] sm:$0xff]  ;;  %v285_v43 = vld [vmem:[#allocation5 + $0x368] sm:$0xff]  ;;  %v1328_v45 = vcombine.low %v273_v34, %v277_v35  ;;  %v1341_v32 = vcombine.high %v202_v26, %v206_v27  ;;  %v210_v34 = vld [vmem:[#allocation5 + $0x110] sm:$0xff] }
  0x71   : > { %v1297_v46 = vcombine.high %v280_v40, %v284_v41  ;;  %v1329_v47 = vcombine.high %v281_v42, %v285_v43  ;;  %v288_v48 = vld [vmem:[#allocation5 + $0x380] sm:$0xff]  ;;  %v289_v50 = vld [vmem:[#allocation5 + $0x388] sm:$0xff]  ;;  %v1298_v52 = vcombine.low %v280_v40, %v284_v41  ;;  %v1330_v54 = vcombine.low %v281_v42, %v285_v43  ;;  %v214_v35 = vld [vmem:[#allocation5 + $0x130] sm:$0xff] }
  0x72   : > { %1042 = vmatpush1.bf16.msra.mxu0 %v1284_v60  ;;  %1106 = vmatpush1.bf16.msra.mxu1 %v1316_v61  ;;  %v292_v49 = vld [vmem:[#allocation5 + $0x3a0] sm:$0xff]  ;;  %v293_v51 = vld [vmem:[#allocation5 + $0x3a8] sm:$0xff]  ;;  %v1343_v40 = vcombine.high %v210_v34, %v214_v35  ;;  %v218_v41 = vld [vmem:[#allocation5 + $0x150] sm:$0xff] }
  0x73   : > { %1044 = vmatprep.subr.bf16.mxu0 %v1285_v62  ;;  %1108 = vmatprep.subr.bf16.mxu1 %v1317_v63  ;;  %v1299_v55 = vcombine.high %v288_v48, %v292_v49  ;;  %v1331_v56 = vcombine.high %v289_v50, %v293_v51  ;;  %v296_v58 = vld [vmem:[#allocation5 + $0x3c0] sm:$0xff]  ;;  %v297_v60 = vld [vmem:[#allocation5 + $0x3c8] sm:$0xff]  ;;  %v1300_v62 = vcombine.low %v288_v48, %v292_v49  ;;  %v222_v42 = vld [vmem:[#allocation5 + $0x170] sm:$0xff] }
  0x74   : > { %v300_v59 = vld [vmem:[#allocation5 + $0x3e0] sm:$0xff]  ;;  %v301_v61 = vld [vmem:[#allocation5 + $0x3e8] sm:$0xff]  ;;  %v1332_v63 = vcombine.low %v289_v50, %v293_v51  ;;  %v219_v43 = vld [vmem:[#allocation5 + $0x158] sm:$0xff] }
  0x75   : > { %v1301_v0 = vcombine.high %v296_v58, %v300_v59  ;;  %v1333_v1 = vcombine.high %v297_v60, %v301_v61  ;;  %v226_v49 = vld [vmem:[#allocation5 + $0x190] sm:$0xff]  ;;  %v227_v51 = vld [vmem:[#allocation5 + $0x198] sm:$0xff] }
  0x76   : > { %1046 = vmatpush1.bf16.msra.mxu0 %v1286_v4  ;;  %1110 = vmatpush1.bf16.msra.mxu1 %v1318_v5  ;;  %v179_v4 = vld [vmem:[#allocation5 + $0x18] sm:$0xff]  ;;  %v230_v50 = vld [vmem:[#allocation5 + $0x1b0] sm:$0xff] }
  0x77   : > { %1048 = vmatprep.subr.bf16.mxu0 %v1287_v6  ;;  %1112 = vmatprep.subr.bf16.mxu1 %v1319_v7  ;;  %v183_v5 = vld [vmem:[#allocation5 + $0x38] sm:$0xff]  ;;  %v1302_v6 = vcombine.low %v296_v58, %v300_v59  ;;  %v1334_v7 = vcombine.low %v297_v60, %v301_v61  ;;  %v234_v59 = vld [vmem:[#allocation5 + $0x1d0] sm:$0xff] }
  0x78   : > { %v1367_v9 = vcombine.high %v179_v4, %v183_v5  ;;  %v238_v60 = vld [vmem:[#allocation5 + $0x1f0] sm:$0xff]  ;;  %v235_v61 = vld [vmem:[#allocation5 + $0x1d8] sm:$0xff] }
  0x7a   : > { %1050 = vmatpush1.bf16.msra.mxu0 %v1288_v12  ;;  %1114 = vmatpush1.bf16.msra.mxu1 %v1320_v13  ;;  %v187_v12 = vld [vmem:[#allocation5 + $0x58] sm:$0xff] }
  0x7b   : > { %1052 = vmatprep.subr.bf16.mxu0 %v1289_v14  ;;  %1116 = vmatprep.subr.bf16.mxu1 %v1321_v15  ;;  %v191_v13 = vld [vmem:[#allocation5 + $0x78] sm:$0xff]  ;;  %v1336_v14 = vcombine.low %v178_v2, %v182_v3  ;;  %v1368_v15 = vcombine.low %v179_v4, %v183_v5  ;;  %v242_v3 = vld [vmem:[#allocation5 + $0x210] sm:$0xff] }
  0x7c   : > { %v1369_v17 = vcombine.high %v187_v12, %v191_v13  ;;  %v246_v4 = vld [vmem:[#allocation5 + $0x230] sm:$0xff]  ;;  %v243_v5 = vld [vmem:[#allocation5 + $0x218] sm:$0xff] }
  0x7e   : > { %1054 = vmatpush1.bf16.msra.mxu0 %v1290_v20  ;;  %1118 = vmatpush1.bf16.msra.mxu1 %v1322_v21  ;;  %v195_v20 = vld [vmem:[#allocation5 + $0x98] sm:$0xff] }
  0x7f   : > { %1056 = vmatprep.subr.bf16.mxu0 %v1291_v22  ;;  %1120 = vmatprep.subr.bf16.mxu1 %v1323_v23  ;;  %v199_v21 = vld [vmem:[#allocation5 + $0xb8] sm:$0xff]  ;;  %v1338_v22 = vcombine.low %v186_v10, %v190_v11  ;;  %v1370_v23 = vcombine.low %v187_v12, %v191_v13  ;;  %v250_v11 = vld [vmem:[#allocation5 + $0x250] sm:$0xff] }
  0x80   : > { %v1371_v25 = vcombine.high %v195_v20, %v199_v21  ;;  %v254_v12 = vld [vmem:[#allocation5 + $0x270] sm:$0xff]  ;;  %v251_v13 = vld [vmem:[#allocation5 + $0x258] sm:$0xff] }
  0x82   : > { %1058 = vmatpush1.bf16.msra.mxu0 %v1292_v28  ;;  %1122 = vmatpush1.bf16.msra.mxu1 %v1324_v29  ;;  %v203_v28 = vld [vmem:[#allocation5 + $0xd8] sm:$0xff] }
  0x83   : > { %1060 = vmatprep.subr.bf16.mxu0 %v1293_v30  ;;  %1124 = vmatprep.subr.bf16.mxu1 %v1325_v31  ;;  %v207_v29 = vld [vmem:[#allocation5 + $0xf8] sm:$0xff]  ;;  %v1340_v30 = vcombine.low %v194_v18, %v198_v19  ;;  %v1372_v31 = vcombine.low %v195_v20, %v199_v21  ;;  %v258_v19 = vld [vmem:[#allocation5 + $0x290] sm:$0xff] }
  0x84   : > { %v1373_v33 = vcombine.high %v203_v28, %v207_v29  ;;  %v262_v20 = vld [vmem:[#allocation5 + $0x2b0] sm:$0xff]  ;;  %v259_v21 = vld [vmem:[#allocation5 + $0x298] sm:$0xff] }
  0x86   : > { %1062 = vmatpush1.bf16.msra.mxu0 %v1294_v36  ;;  %1126 = vmatpush1.bf16.msra.mxu1 %v1326_v37  ;;  %v211_v36 = vld [vmem:[#allocation5 + $0x118] sm:$0xff] }
  0x87   : > { %1064 = vmatprep.subr.bf16.mxu0 %v1295_v38  ;;  %1128 = vmatprep.subr.bf16.mxu1 %v1327_v39  ;;  %v215_v37 = vld [vmem:[#allocation5 + $0x138] sm:$0xff]  ;;  %v1342_v38 = vcombine.low %v202_v26, %v206_v27  ;;  %v1374_v39 = vcombine.low %v203_v28, %v207_v29  ;;  %v266_v27 = vld [vmem:[#allocation5 + $0x2d0] sm:$0xff] }
  0x88   : > { %v270_v28 = vld [vmem:[#allocation5 + $0x2f0] sm:$0xff]  ;;  %v267_v29 = vld [vmem:[#allocation5 + $0x2d8] sm:$0xff] }
  0x8a   : > { %1066 = vmatpush1.bf16.msra.mxu0 %v1296_v44  ;;  %1130 = vmatpush1.bf16.msra.mxu1 %v1328_v45  ;;  %v223_v44 = vld [vmem:[#allocation5 + $0x178] sm:$0xff]  ;;  %v1344_v45 = vcombine.low %v210_v34, %v214_v35  ;;  %v274_v35 = vld [vmem:[#allocation5 + $0x310] sm:$0xff] }
  0x8b   : > { %1068 = vmatprep.subr.bf16.mxu0 %v1297_v46  ;;  %1132 = vmatprep.subr.bf16.mxu1 %v1329_v47  ;;  %v1376_v46 = vcombine.low %v211_v36, %v215_v37  ;;  %v1345_v47 = vcombine.high %v218_v41, %v222_v42  ;;  %v1377_v48 = vcombine.high %v219_v43, %v223_v44 }
  0x8e   : > { %1070 = vmatpush1.bf16.msra.mxu0 %v1298_v52  ;;  %1134 = vmatpush1.bf16.msra.mxu1 %v1330_v54  ;;  %v231_v52 = vld [vmem:[#allocation5 + $0x1b8] sm:$0xff]  ;;  %v1346_v54 = vcombine.low %v218_v41, %v222_v42  ;;  %v282_v42 = vld [vmem:[#allocation5 + $0x350] sm:$0xff] }
  0x8f   : > { %1072 = vmatprep.subr.bf16.mxu0 %v1299_v55  ;;  %1136 = vmatprep.subr.bf16.mxu1 %v1331_v56  ;;  %v1378_v55 = vcombine.low %v219_v43, %v223_v44  ;;  %v1347_v56 = vcombine.high %v226_v49, %v230_v50  ;;  %v1379_v58 = vcombine.high %v227_v51, %v231_v52  ;;  %v286_v43 = vld [vmem:[#allocation5 + $0x370] sm:$0xff]  ;;  %v283_v44 = vld [vmem:[#allocation5 + $0x358] sm:$0xff] }
  0x92   : > { %1074 = vmatpush1.bf16.msra.mxu0 %v1300_v62  ;;  %1138 = vmatpush1.bf16.msra.mxu1 %v1332_v63  ;;  %v239_v62 = vld [vmem:[#allocation5 + $0x1f8] sm:$0xff]  ;;  %v1348_v63 = vcombine.low %v226_v49, %v230_v50  ;;  %v290_v50 = vld [vmem:[#allocation5 + $0x390] sm:$0xff] }
  0x93   : > { %1076 = vmatprep.subr.bf16.mxu0 %v1301_v0  ;;  %1140 = vmatprep.subr.bf16.mxu1 %v1333_v1  ;;  %v1380_v0 = vcombine.low %v227_v51, %v231_v52  ;;  %v1349_v1 = vcombine.high %v234_v59, %v238_v60  ;;  %v1381_v2 = vcombine.high %v235_v61, %v239_v62  ;;  %v294_v51 = vld [vmem:[#allocation5 + $0x3b0] sm:$0xff]  ;;  %v291_v52 = vld [vmem:[#allocation5 + $0x398] sm:$0xff] }
  0x96   : > { %1078 = vmatpush1.bf16.msra.mxu0 %v1302_v6  ;;  %1142 = vmatpush1.bf16.msra.mxu1 %v1334_v7  ;;  %v247_v6 = vld [vmem:[#allocation5 + $0x238] sm:$0xff]  ;;  %v1350_v7 = vcombine.low %v234_v59, %v238_v60  ;;  %v298_v60 = vld [vmem:[#allocation5 + $0x3d0] sm:$0xff] }
  0x97   : > { %1144 = vmatprep.subr.bf16.mxu0 %v1335_v8  ;;  %1208 = vmatprep.subr.bf16.mxu1 %v1367_v9  ;;  %v1382_v8 = vcombine.low %v235_v61, %v239_v62  ;;  %v1351_v9 = vcombine.high %v242_v3, %v246_v4  ;;  %v1383_v10 = vcombine.high %v243_v5, %v247_v6  ;;  %v302_v61 = vld [vmem:[#allocation5 + $0x3f0] sm:$0xff]  ;;  %v299_v62 = vld [vmem:[#allocation5 + $0x3d8] sm:$0xff] }
  0x99   : > { %636 = vmatmul.mubr.f32.vlgmr.msra.gmra.mrb[0].mxu0 %v1753_v53  ;;  %707 = vmatmul.mubr.f32.vlgmr.msra.gmra.mrb[0].mxu1 %v1753_v53 }
  0x9a   : > { %1146 = vmatpush1.bf16.msra.mxu0 %v1336_v14  ;;  %1210 = vmatpush1.bf16.msra.mxu1 %v1368_v15  ;;  %v255_v14 = vld [vmem:[#allocation5 + $0x278] sm:$0xff]  ;;  %v1352_v15 = vcombine.low %v242_v3, %v246_v4  ;;  %v1366_v4 = vcombine.low %v298_v60, %v302_v61 }
  0x9b   : > { %1148 = vmatprep.subr.bf16.mxu0 %v1337_v16  ;;  %1212 = vmatprep.subr.bf16.mxu1 %v1369_v17  ;;  %v1384_v16 = vcombine.low %v243_v5, %v247_v6  ;;  %v1353_v17 = vcombine.high %v250_v11, %v254_v12  ;;  %v1385_v18 = vcombine.high %v251_v13, %v255_v14  ;;  %v1593_v6 = vmov 1983009808  }
  0x9c   : > { %777 = vmatprep.mubr.f32.mxu0 %v1757_v57  ;;  %848 = vmatprep.mubr.f32.mxu1 %v1757_v57  ;;  %v1375_v57 = vcombine.high %v211_v36, %v215_v37  ;;  %v278_v36 = vld [vmem:[#allocation5 + $0x330] sm:$0xff]  ;;  %v275_v37 = vld [vmem:[#allocation5 + $0x318] sm:$0xff] }
  0x9e   : > { %1150 = vmatpush1.bf16.msra.mxu0 %v1338_v22  ;;  %1214 = vmatpush1.bf16.msra.mxu1 %v1370_v23  ;;  %v263_v22 = vld [vmem:[#allocation5 + $0x2b8] sm:$0xff]  ;;  %v1354_v23 = vcombine.low %v250_v11, %v254_v12 }
  0x9f   : > { %1152 = vmatprep.subr.bf16.mxu0 %v1339_v24  ;;  %1216 = vmatprep.subr.bf16.mxu1 %v1371_v25  ;;  %v1386_v24 = vcombine.low %v251_v13, %v255_v14  ;;  %v1355_v25 = vcombine.high %v258_v19, %v262_v20  ;;  %v1387_v26 = vcombine.high %v259_v21, %v263_v22 }
  0xa2   : > { %1154 = vmatpush1.bf16.msra.mxu0 %v1340_v30  ;;  %1218 = vmatpush1.bf16.msra.mxu1 %v1372_v31  ;;  %v271_v30 = vld [vmem:[#allocation5 + $0x2f8] sm:$0xff]  ;;  %v1356_v31 = vcombine.low %v258_v19, %v262_v20 }
  0xa3   : > { %1156 = vmatprep.subr.bf16.mxu0 %v1341_v32  ;;  %1220 = vmatprep.subr.bf16.mxu1 %v1373_v33  ;;  %v1388_v32 = vcombine.low %v259_v21, %v263_v22  ;;  %v1357_v33 = vcombine.high %v266_v27, %v270_v28  ;;  %v1389_v34 = vcombine.high %v267_v29, %v271_v30 }
  0xa6   : > { %1158 = vmatpush1.bf16.msra.mxu0 %v1342_v38  ;;  %1222 = vmatpush1.bf16.msra.mxu1 %v1374_v39  ;;  %v279_v38 = vld [vmem:[#allocation5 + $0x338] sm:$0xff]  ;;  %v1358_v39 = vcombine.low %v266_v27, %v270_v28 }
  0xa7   : > { %1160 = vmatprep.subr.bf16.mxu0 %v1343_v40  ;;  %1224 = vmatprep.subr.bf16.mxu1 %v1375_v57  ;;  %v1390_v40 = vcombine.low %v267_v29, %v271_v30  ;;  %v1359_v57 = vcombine.high %v274_v35, %v278_v36  ;;  %v1391_v41 = vcombine.high %v275_v37, %v279_v38 }
  0xaa   : > { %1162 = vmatpush1.bf16.msra.mxu0 %v1344_v45  ;;  %1226 = vmatpush1.bf16.msra.mxu1 %v1376_v46  ;;  %v287_v45 = vld [vmem:[#allocation5 + $0x378] sm:$0xff]  ;;  %v1360_v46 = vcombine.low %v274_v35, %v278_v36 }
  0xab   : > { %1164 = vmatprep.subr.bf16.mxu0 %v1345_v47  ;;  %1228 = vmatprep.subr.bf16.mxu1 %v1377_v48  ;;  %v1392_v47 = vcombine.low %v275_v37, %v279_v38  ;;  %v1361_v48 = vcombine.high %v282_v42, %v286_v43  ;;  %v1393_v49 = vcombine.high %v283_v44, %v287_v45 }
  0xae   : > { %1166 = vmatpush1.bf16.msra.mxu0 %v1346_v54  ;;  %1230 = vmatpush1.bf16.msra.mxu1 %v1378_v55  ;;  %v295_v54 = vld [vmem:[#allocation5 + $0x3b8] sm:$0xff]  ;;  %v1362_v55 = vcombine.low %v282_v42, %v286_v43 }
  0xaf   : > { %1168 = vmatprep.subr.bf16.mxu0 %v1347_v56  ;;  %1232 = vmatprep.subr.bf16.mxu1 %v1379_v58  ;;  %v1394_v56 = vcombine.low %v283_v44, %v287_v45  ;;  %v1363_v58 = vcombine.high %v290_v50, %v294_v51  ;;  %v1395_v59 = vcombine.high %v291_v52, %v295_v54 }
  0xb2   : > { %1170 = vmatpush1.bf16.msra.mxu0 %v1348_v63  ;;  %1234 = vmatpush1.bf16.msra.mxu1 %v1380_v0  ;;  %v303_v63 = vld [vmem:[#allocation5 + $0x3f8] sm:$0xff]  ;;  %v1364_v0 = vcombine.low %v290_v50, %v294_v51 }
  0xb3   : > { %1172 = vmatprep.subr.bf16.mxu0 %v1349_v1  ;;  %1236 = vmatprep.subr.bf16.mxu1 %v1381_v2  ;;  %v1396_v1 = vcombine.low %v291_v52, %v295_v54  ;;  %v1365_v2 = vcombine.high %v298_v60, %v302_v61  ;;  %v1397_v3 = vcombine.high %v299_v62, %v303_v63 }
  0xb4   : > { %v1398_v5 = vcombine.low %v299_v62, %v303_v63 }
  0xb6   : > { %1174 = vmatpush1.bf16.msra.mxu0 %v1350_v7  ;;  %1238 = vmatpush1.bf16.msra.mxu1 %v1382_v8  ;;  %v866_v7 = vunpack.c.l.s4 %v1593_v6  ;;  %v868_v8 = vlaneseq }
  0xb7   : > { %1176 = vmatprep.subr.bf16.mxu0 %v1351_v9  ;;  %1240 = vmatprep.subr.bf16.mxu1 %v1383_v10 }
  0xb8   : > { %v867_v9 = vunpack.c.0.s8 %v866_v7  ;;  %v869_v10 = vshrl.u32 %v868_v8, 7 }
  0xba   : > { %1178 = vmatpush1.bf16.msra.mxu0 %v1352_v15  ;;  %1242 = vmatpush1.bf16.msra.mxu1 %v1384_v16  ;;  %v870_v12 = vsub.s32 %v867_v9, %v869_v10 }
  0xbb   : > { %1180 = vmatprep.subr.bf16.mxu0 %v1353_v17  ;;  %1244 = vmatprep.subr.bf16.mxu1 %v1385_v18 }
  0xbe   : > { %1182 = vmatpush1.bf16.msra.mxu0 %v1354_v23  ;;  %1246 = vmatpush1.bf16.msra.mxu1 %v1386_v24 }
  0xbf   : > { %1184 = vmatprep.subr.bf16.mxu0 %v1355_v25  ;;  %1248 = vmatprep.subr.bf16.mxu1 %v1387_v26 }
  0xc2   : > { %1186 = vmatpush1.bf16.msra.mxu0 %v1356_v31  ;;  %1250 = vmatpush1.bf16.msra.mxu1 %v1388_v32 }
  0xc3   : > { %1188 = vmatprep.subr.bf16.mxu0 %v1357_v33  ;;  %1252 = vmatprep.subr.bf16.mxu1 %v1389_v34 }
  0xc6   : > { %1190 = vmatpush1.bf16.msra.mxu0 %v1358_v39  ;;  %1254 = vmatpush1.bf16.msra.mxu1 %v1390_v40 }
  0xc7   : > { %1192 = vmatprep.subr.bf16.mxu0 %v1359_v57  ;;  %1256 = vmatprep.subr.bf16.mxu1 %v1391_v41 }
  0xca   : > { %1194 = vmatpush1.bf16.msra.mxu0 %v1360_v46  ;;  %1258 = vmatpush1.bf16.msra.mxu1 %v1392_v47 }
  0xcb   : > { %1196 = vmatprep.subr.bf16.mxu0 %v1361_v48  ;;  %1260 = vmatprep.subr.bf16.mxu1 %v1393_v49 }
  0xce   : > { %1198 = vmatpush1.bf16.msra.mxu0 %v1362_v55  ;;  %1262 = vmatpush1.bf16.msra.mxu1 %v1394_v56 }
  0xcf   : > { %1200 = vmatprep.subr.bf16.mxu0 %v1363_v58  ;;  %1264 = vmatprep.subr.bf16.mxu1 %v1395_v59 }
  0xd2   : > { %1202 = vmatpush1.bf16.msra.mxu0 %v1364_v0  ;;  %1266 = vmatpush1.bf16.msra.mxu1 %v1396_v1 }
  0xd3   : > { %1204 = vmatprep.subr.bf16.mxu0 %v1365_v2  ;;  %1268 = vmatprep.subr.bf16.mxu1 %v1397_v3 }
  0xd6   : > { %1206 = vmatpush1.bf16.msra.mxu0 %v1366_v4  ;;  %1270 = vmatpush1.bf16.msra.mxu1 %v1398_v5 }
  0xd9   : > { %778 = vmatmul.mubr.f32.vlgmr.msra.gmra.mrb[2].mxu0 %v1753_v53  ;;  %849 = vmatmul.mubr.f32.vlgmr.msra.gmra.mrb[2].mxu1 %v1753_v53 }
 0x16c   : > { %v637_v11 = vpop.f32.mrb[0].mxu0  ;;  %v708_v13 = vpop.f32.mrb[0].mxu1 }
 0x16d   : > { %v639_v14 = vpop.f32.mrb[1].mxu0  ;;  %v710_v16 = vpop.f32.mrb[1].mxu1 }
 0x16e   : > { %v863_v15 = vcombine.low %v637_v11, %v639_v14  ;;  %v864_v17 = vcombine.low %v708_v13, %v710_v16 }
 0x170   : > { %v871_v18 = vrot.slane %v863_v15, %v870_v12  ;;  %v878_v19 = vrot.slane %v864_v17, %v870_v12 }
 0x172   : > { %v879_v20 = vcombine.low %v871_v18, %v878_v19 }
 0x174   : > { %899 = vst [vmem:[%s174_s17] sm:$0xff] %v879_v20 }
 0x1ac   : > { %v779_v53 = vpop.f32.mrb[2].mxu0  ;;  %v850_v21 = vpop.f32.mrb[2].mxu1 }
 0x1ad   : > { %v781_v22 = vpop.f32.mrb[3].mxu0  ;;  %v852_v24 = vpop.f32.mrb[3].mxu1 }
 0x1ae   : > { %v880_v23 = vcombine.low %v779_v53, %v781_v22  ;;  %v881_v25 = vcombine.low %v850_v21, %v852_v24 }
 0x1b0   : > { %v888_v26 = vrot.slane %v880_v23, %v870_v12  ;;  %v895_v27 = vrot.slane %v881_v25, %v870_v12 }
 0x1b2   : > { %v896_v28 = vcombine.low %v888_v26, %v895_v27 }
 0x1b4   : > { %900 = vst [vmem:[%s174_s17 + $0x8] sm:$0xff] %v896_v28 }
 0x1b5   : > { %1530 = shalt.err (!%p1527_p7)
}
 0x1b6   : > { %s1531_s7 = scalar_lea.hbm %s1772_s30, 256  ;;  %s1535_s25 = scalar_lea.hbm %s1817_s2, 1024 }
 0x1b7   : > { %p1532_p9 = scmp.ne.s32.totalorder %s1772_s30, %s1531_s7  ;;  %p1536_p0 = scmp.lt.u32.totalorder %s1772_s30, %s1817_s2 }
 0x1b8   : > { %p1537_p10 = scmp.lt.u32.totalorder %s1535_s25, %s1531_s7  ;;  %p1539_p1 = scmp.lt.u32.totalorder %s1531_s7, %s1772_s30 }
 0x1b9   : > { %p1533_p11 = pnand %p1532_p9, %p1693_p12 }
 0x1ba   : > { %p1538_p2 = por %p1537_p10, %p1536_p0 }
 0x1bb   : > { %p1534_p5 = pneg %p1533_p11 }
 0x1bc   : > { %p1540_p4 = por %p1539_p1, %p1538_p2 }
 0x1be   : > { %p1541_p6 = pnand %p1540_p4, %p1534_p5 }
 0x1c0   : > { %1544 = shalt.err (!%p1541_p6)
}
 0x1c1   : > { %1405 = dma.vmem_to_hbm [thread:$0]  (%p1693_p12), %s1774_s22, 256, %s1772_s30, %s902_s3  }
 0x1c2 PF: > { %p1422_p8 = scmp.ge.s32.totalorder %s1587_s12, 2  ;;  %s928_s19 = sand.u32 1, %s1575_s9  }
 0x1c3   : > { %p1832_p13 = scmp.ne.s32.totalorder %s1822_s16, 0  ;;  %s929_s29 = scalar_lea.sflag [#allocation4], %s928_s19 }
 0x1c5   : > { %p1416_p3 = pnand %p1422_p8, %p1832_p13 }
 0x1c7   : > { %1570 = dma.done.wait (!%p1416_p3), %s929_s29, 256  }
 0x1c8   : > { %1572 = vsyncadd (!%p1416_p3), %s929_s29, 4294967040  ;;  %p16_p7 = scmp.ge.s32.totalorder %s1663_s21, 6   ;;  %s1833_s9 = smov %s1579_s10 }
 0x1c9   : > { %s1834_s10 = smov %s1583_s11  ;;  %s1835_s11 = smov %s1689_s8 }
 0x1ca   : > { %s1836_s12 = smov %s1663_s21  ;;  %18 = sbr.rel (!%p16_p7) target bundleno = 6 (0x6), region = 77 }
 0x1d1   :  { %934 = vsyncpa [#allocation3], 1 }
 0x1d2   :  { %936 = vsyncpa [#allocation3 + $0x1], 1 }
 0x1d3   :  { %937 = vsyncpa [#allocation6], 1 }
 0x1d4   :  { %938 = vsyncpa [#allocation4], 1 }
 0x1d5   :  { %940 = vsyncpa [#allocation4 + $0x1], 1 }

</bundles_post_ra>
